<compile_context>
chip_gen: v7x
topology: tpu7x:2x2x1
jax: 0.10.0
libtpu: 0.0.40
codegen_flags: <defaults>
</compile_context>

<pallas_src>
import jax
import jax.numpy as jnp
from jax.experimental import pallas as pl
from jax.experimental.pallas import tpu as pltpu


def _h_swish_kernel(x_ref, o_ref):
    x = x_ref[...]
    # h_sigmoid(x) = relu6(x + 3) / 6 ; h_swish(x) = x * h_sigmoid(x)
    # Weak-typed constants keep compute in the input dtype (no forced upcast).
    hs = jnp.clip(x + 3.0, 0.0, 6.0) * (1.0 / 6.0)
    o_ref[...] = (x * hs).astype(o_ref.dtype)


def _choose_lane_width(total: int) -> int:
    """Prefer a wide (lane-dense) last dim, but avoid excessive padding."""
    # Exact fit first (no padding at all).
    for w in (2048, 1024, 512, 256, 128):
        if total % (16 * w) == 0:
            return w
    # Otherwise: widest width whose pad overhead is < 12.5% of the data.
    for w in (2048, 1024, 512, 256):
        if ((-total) % (16 * w)) * 8 <= total:
            return w
    return 128


def h_swish(x: jax.Array, *, donate: bool = False) -> jax.Array:
    """Elementwise hard-swish. Accepts NCHW (or any shape); returns same shape/dtype."""
    orig_shape = x.shape
    orig_dtype = x.dtype

    flat = x.reshape(-1)
    total = flat.shape[0]

    # Lane-dense 2D slab (rows, W). Pad so rows is a multiple of 16 (clean for
    # both f32 sublane=8 tiling and bf16 row packing). Padded zeros map to
    # h_swish(0) = 0 and are sliced off afterwards.
    W = _choose_lane_width(total)
    chunk = 16 * W
    pad = (-total) % chunk
    if pad:
        flat = jnp.pad(flat, (0, pad))
    rows = flat.shape[0] // W
    x2d = flat.reshape(rows, W)

    # Row-tile size: ~2 MiB per buffer (in + out, double-buffered -> ~8 MiB VMEM),
    # safe on v5e/v6e scoped defaults and well under v7x's 64 MiB physical VMEM.
    itemsize = jnp.dtype(orig_dtype).itemsize
    target_bytes = 2 << 20
    block_rows = max(16, (target_bytes // (W * itemsize)) // 16 * 16)
    block_rows = min(block_rows, rows)

    num_blocks = pl.cdiv(rows, block_rows)

    call_kwargs = {}
    if donate:
        # Caller promises not to reuse x: reuse its HBM buffer for the output.
        call_kwargs["input_output_aliases"] = {0: 0}

    out2d = pl.pallas_call(
        _h_swish_kernel,
        out_shape=jax.ShapeDtypeStruct((rows, W), orig_dtype),
        grid_spec=pltpu.PrefetchScalarGridSpec(
            num_scalar_prefetch=0,
            grid=(num_blocks,),
            in_specs=[pl.BlockSpec((block_rows, W), lambda i: (i, 0))],
            out_specs=pl.BlockSpec((block_rows, W), lambda i: (i, 0)),
        ),
        compiler_params=pltpu.CompilerParams(
            # "parallel": row tiles are independent; lets v7x shard across both
            # TensorCores. Purely mem-bound op -> all wins are memory-system.
            dimension_semantics=("parallel",),
        ),
        **call_kwargs,
    )(x2d)

    out = out2d.reshape(-1)
    if pad:
        out = out[:total]
    return out.reshape(orig_shape)


if __name__ == "__main__":
    key = jax.random.PRNGKey(0)
    # NCHW, matching PyTorch conv conventions (h_swish itself is elementwise).
    x = jax.random.normal(key, (2, 4, 16, 16), dtype=jnp.float32) * 4.0

    y = h_swish(x)
    y = jax.block_until_ready(y)

    # Reference in plain JAX: x * clip(x+3, 0, 6) / 6
    ref = x * jnp.clip(x + 3.0, 0.0, 6.0) / 6.0
    assert y.shape == x.shape and y.dtype == x.dtype
    assert jnp.allclose(y, ref, atol=1e-6, rtol=1e-6), "mismatch vs reference"

    # Also exercise a larger, non-divisible shape to cover tiling / partial-block path.
    x2 = jax.random.normal(jax.random.PRNGKey(1), (3, 7, 33, 65), dtype=jnp.float32) * 3.0
    y2 = jax.block_until_ready(h_swish(x2))
    ref2 = x2 * jnp.clip(x2 + 3.0, 0.0, 6.0) / 6.0
    assert jnp.allclose(y2, ref2, atol=1e-6, rtol=1e-6), "mismatch vs reference (large)"

    print("KERNEL_OK")
</pallas_src>

<mosaic_0001>
module attributes {stable_mosaic.version = 11 : i64} {
  func.func @_h_swish_kernel(%arg0: i32, %arg1: memref<16x128xf32, #tpu.memory_space<vmem>>, %arg2: memref<16x128xf32, #tpu.memory_space<vmem>>) attributes {dimension_semantics = [#tpu.dimension_semantics<parallel>], iteration_bounds = array<i64: 1>, scalar_prefetch = 0 : i64, scratch_operands = 0 : i64, tpu.core_type = #tpu.core_type<tc>, window_params = [{transform_indices = @transform_0, window_bounds = array<i64: 16, 128>}, {transform_indices = @transform_1, window_bounds = array<i64: 16, 128>}]} {
    %c0 = arith.constant 0 : index
    %c0_0 = arith.constant 0 : index
    %0 = vector.load %arg1[%c0, %c0_0] : memref<16x128xf32, #tpu.memory_space<vmem>>, vector<16x128xf32>
    %cst = arith.constant 3.000000e+00 : f32
    %1 = vector.broadcast %cst : f32 to vector<16x128xf32>
    %2 = arith.addf %0, %1 : vector<16x128xf32>
    %cst_1 = arith.constant 0.000000e+00 : f32
    %cst_2 = arith.constant 6.000000e+00 : f32
    %3 = vector.broadcast %cst_1 : f32 to vector<16x128xf32>
    %4 = arith.maximumf %3, %2 : vector<16x128xf32>
    %5 = vector.broadcast %cst_2 : f32 to vector<16x128xf32>
    %6 = arith.minimumf %5, %4 : vector<16x128xf32>
    %cst_3 = arith.constant 0.166666672 : f32
    %7 = vector.broadcast %cst_3 : f32 to vector<16x128xf32>
    %8 = arith.mulf %6, %7 : vector<16x128xf32>
    %9 = arith.mulf %0, %8 : vector<16x128xf32>
    %c0_4 = arith.constant 0 : index
    %c0_5 = arith.constant 0 : index
    %10 = vector.load %arg2[%c0_4, %c0_5] : memref<16x128xf32, #tpu.memory_space<vmem>>, vector<16x128xf32>
    tpu.vector_store %arg2[%c0_4, %c0_5], %9 {strides = array<i32>} : memref<16x128xf32, #tpu.memory_space<vmem>>, vector<16x128xf32>,
    return
  }
  func.func @transform_0(%arg0: i32) -> (i32, i32) {
    %c0_i32 = arith.constant 0 : i32
    %c0_i32_0 = arith.constant 0 : i32
    return %arg0, %c0_i32 : i32, i32
  }
  func.func @transform_1(%arg0: i32) -> (i32, i32) {
    %c0_i32 = arith.constant 0 : i32
    %c0_i32_0 = arith.constant 0 : i32
    return %arg0, %c0_i32 : i32, i32
  }
}

</mosaic_0001>

<bundles_post_ra>
// kernel: tpu_custom_call.1
= control target key start
LH: loop header
LB: loop body
LE: loop exit
PB: predicated region body
PF: predicated region fallthrough
CT: control target
= control target key end

     0   :  { %6 = vsyncpa [#allocation3], 0  ;;  %s150_s0 = inlined_call_operand.hbm [shape: f32[16,128], index: 0, kind: input, shape index: {}]   ;;  %s151_s1 = inlined_call_operand.hbm [shape: f32[16,128], index: 1, kind: output, shape index: {}]  }
   0x1   :  { %7 = vsyncpa [#allocation4], 0  ;;  %s106_s6 = smov [#allocation2]   ;;  %s58_s10 = scalar_lea.hbm %s150_s0, 256 }
   0x2   :  { %s13_s7 = sshll.u32 %s106_s6, 4  ;;  %p59_p0 = scmp.ne.s32.totalorder %s150_s0, %s58_s10  ;;  %s14_s7 = int_to_ptr.vmem [resolvable:$true] %s13_s7 }
   0x3   :  { %p62_p1 = scmp.lt.u32.totalorder %s58_s10, %s150_s0 }
   0x5   :  { %p64_p2 = pnand %p62_p1, %p59_p0 }
   0x7   :  { %67 = shalt.err (!%p64_p2)
}
   0x8   :  { %s68_s15 = scalar_lea.vmem %s14_s7, 256  ;;  %p73_p4 = scmp.lt.s32.totalorder %s14_s7, %s14_s7 }
   0x9   :  { %p69_p3 = scmp.ne.s32.totalorder %s14_s7, %s68_s15  ;;  %p74_p5 = scmp.lt.s32.totalorder %s68_s15, %s68_s15 }
   0xb   :  { %p75_p6 = por %p74_p5, %p73_p4 }
   0xd   :  { %p76_p7 = pnand %p75_p6, %p69_p3 }
   0xf   :  { %79 = shalt.err (!%p76_p7)
}
  0x10   :  { %s107_s16 = smov 128   ;;  %s108_s17 = smov 8  }
  0x11   :  { %19 = dma.hbm_to_vmem [thread:$0]  %s150_s0, 256, %s14_s7, [#allocation3], %s107_s16, %s107_s16, %s108_s17  }
  0x12   :  { %102 = dma.done.wait [#allocation3], 256  }
  0x13   :  { %103 = vsyncadd [#allocation3], 4294967040  ;;  %v23_v0 = vld [vmem:[#allocation2] sm:$0xff]  ;;  %v24_v1 = vld [vmem:[#allocation2 + $0x8] sm:$0xff]  ;;  %s109_s20 = smov [#allocation5]  }
  0x14   :  { %v25_v2 = vadd.f32 3.0, %v23_v0  ;;  %v26_v3 = vadd.f32 3.0, %v24_v1  ;;  %s42_s21 = sshll.u32 %s109_s20, 4  ;;  %s43_s21 = int_to_ptr.vmem [resolvable:$true] %s42_s21 }
  0x15   :  { %s80_s0 = scalar_lea.vmem %s43_s21, 256  ;;  %p85_p9 = scmp.lt.s32.totalorder %s43_s21, %s43_s21 }
  0x16   :  { %v27_v4 = vmax.f32 %v25_v2, 0.0  ;;  %v28_v5 = vmax.f32 %v26_v3, 0.0  ;;  %p81_p8 = scmp.ne.s32.totalorder %s43_s21, %s80_s0  ;;  %p86_p10 = scmp.lt.s32.totalorder %s80_s0, %s80_s0 }
  0x18   :  { %v29_v6 = vmin.f32 %v27_v4, 6.0  ;;  %v30_v7 = vmin.f32 %v28_v5, 6.0  ;;  %p87_p11 = por %p86_p10, %p85_p9 }
  0x1a   :  { %v31_v8 = vmul.f32 0.16666667, %v29_v6  ;;  %v32_v9 = vmul.f32 0.16666667, %v30_v7  ;;  %p88_p12 = pnand %p87_p11, %p81_p8 }
  0x1c   :  { %v33_v10 = vmul.f32 %v31_v8, %v23_v0  ;;  %v34_v11 = vmul.f32 %v32_v9, %v24_v1 }
  0x1e   :  { %35 = vst [vmem:[#allocation5] sm:$0xff] %v33_v10  ;;  %36 = vst [vmem:[#allocation5 + $0x8] sm:$0xff] %v34_v11 }
  0x1f   :  { %91 = shalt.err (!%p88_p12)
}
  0x20   :  { %s92_s24 = scalar_lea.hbm %s151_s1, 256 }
  0x21   :  { %p93_p13 = scmp.ne.s32.totalorder %s151_s1, %s92_s24  ;;  %p96_p0 = scmp.lt.u32.totalorder %s92_s24, %s151_s1 }
  0x23   :  { %p98_p1 = pnand %p96_p0, %p93_p13 }
  0x25   :  { %101 = shalt.err (!%p98_p1)
}
  0x26   :  { %48 = dma.vmem_to_hbm [thread:$0]  %s43_s21, 256, %s151_s1, [#allocation4], %s107_s16, %s107_s16, %s108_s17  }
  0x27   :  { %104 = dma.done.wait [#allocation4], 256  }
  0x28   :  { %105 = vsyncadd [#allocation4], 4294967040 }
  0x29   :  { %52 = vsyncpa [#allocation3], 1 }
  0x2a   :  { %53 = vsyncpa [#allocation4], 1 }

</bundles_post_ra>
